<compile_context>
chip_gen: v7x
topology: tpu7x:2x2x1
jax: 0.10.0
libtpu: 0.0.40
codegen_flags: <defaults>
</compile_context>

<pallas_src>
import jax
import jax.numpy as jnp
from jax.experimental import pallas as pl
from jax.experimental.pallas import tpu as pltpu


# ---------------------------------------------------------------------------
# Kernel
# ---------------------------------------------------------------------------
def _noise_add_kernel(w_ref, img_ref, noise_ref, out_ref):
    # w_ref: SMEM scalar (1,) f32.  img/out: (1, C_blk, T_hw).  noise: (1, 1, T_hw),
    # broadcast over the channel axis by jnp broadcasting.  Compute in f32.
    img = img_ref[...].astype(jnp.float32)
    nz = noise_ref[...].astype(jnp.float32)
    out_ref[...] = (img + w_ref[0] * nz).astype(out_ref.dtype)


# ---------------------------------------------------------------------------
# Block-size selection (lane-dense, ~2 MiB image blocks, (8,128)-legal)
# ---------------------------------------------------------------------------
def _largest_divisor(n, multiple, limit):
    """Largest d <= limit with d % multiple == 0 and n % d == 0 (None if none)."""
    best = None
    d = multiple
    limit = min(n, limit)
    while d <= limit:
        if n % d == 0:
            best = d
        d += multiple
    return best


def _sublane_multiple(dtype):
    itemsize = jnp.dtype(dtype).itemsize
    return {4: 8, 2: 16, 1: 32}.get(itemsize, 8)


def _pick_blocks(C, HW, dtype, target_bytes=2 << 20):
    dsize = jnp.dtype(dtype).itemsize
    sub = _sublane_multiple(dtype)
    # Lane axis: cap so that even at the minimum sublane block (sub rows) the
    # whole block honors the byte budget (review fix: was target_bytes//dsize,
    # which produced 8 MiB blocks for large HW).
    lane_limit = max(128, target_bytes // (sub * dsize))
    t_hw = _largest_divisor(HW, 128, lane_limit)
    if t_hw is None:
        t_hw = HW                      # HW < 128 or not 128-divisible: full extent
    # Sublane axis: dtype-aware multiple of `sub`, filling the remaining budget.
    rem = max(sub, target_bytes // (t_hw * dsize))
    c_blk = _largest_divisor(C, sub, rem)
    if c_blk is None:
        c_blk = C                      # no legal divisor: use full channel extent
    return t_hw, c_blk


# ---------------------------------------------------------------------------
# Wrapper
# ---------------------------------------------------------------------------
def noise_injection(image, weight, noise=None, *, key=None):
    """Pallas implementation of NoiseInjection.forward.

    image:  (B, C, H, W)
    weight: (1,) scalar parameter
    noise:  (B, 1, H, W), or None -> sampled N(0,1) (requires `key`)
    """
    B, C, H, W = image.shape
    HW = H * W
    dsize = jnp.dtype(image.dtype).itemsize

    if noise is None:
        if key is None:
            raise ValueError("noise_injection: `key` is required when noise is None")
        noise = jax.random.normal(key, (B, 1, H, W), dtype=jnp.float32)

    t_hw, c_blk = _pick_blocks(C, HW, image.dtype)
    n_hw = HW // t_hw

    # Megacore (v7x): make sure >=2 independent blocks exist on the parallel
    # axes when B == 1, by splitting the HW axis if a lane-dense split exists.
    if B == 1 and n_hw < 2:
        half = _largest_divisor(HW, 128, t_hw // 2)
        if half is not None:
            t_hw = half
            n_hw = HW // t_hw

    n_cb = C // c_blk
    # Channel-blocks innermost ("arbitrary") so the broadcast noise block index
    # is constant across consecutive grid steps and its re-DMA is skipped.
    grid = (B, n_hw, n_cb)

    img3 = image.reshape(B, C, HW)
    noise3 = noise.reshape(B, 1, HW)           # native dtype; promoted in-kernel
    weight = weight.reshape((1,)).astype(jnp.float32)

    img_spec = pl.BlockSpec((1, c_blk, t_hw), lambda b, hb, cb: (b, cb, hb))
    out_spec = pl.BlockSpec((1, c_blk, t_hw), lambda b, hb, cb: (b, cb, hb))
    noise_spec = pl.BlockSpec((1, 1, t_hw), lambda b, hb, cb: (b, 0, hb))
    smem_spec = pl.BlockSpec(memory_space=pltpu.MemorySpace.SMEM)

    n_dsize = jnp.dtype(noise3.dtype).itemsize
    cost = pl.CostEstimate(
        flops=2 * B * C * HW,
        transcendentals=0,
        bytes_accessed=2 * B * C * HW * dsize + B * HW * n_dsize,
    )
    cparams = pltpu.CompilerParams(
        dimension_semantics=("parallel", "parallel", "arbitrary"),
        vmem_limit_bytes=48 << 20,
    )

    out3 = pl.pallas_call(
        _noise_add_kernel,
        out_shape=jax.ShapeDtypeStruct((B, C, HW), image.dtype),
        grid=grid,
        in_specs=[
            smem_spec,   # weight (SMEM scalar)
            img_spec,    # image
            noise_spec,  # noise (broadcast over channels)
        ],
        out_specs=out_spec,
        compiler_params=cparams,
        cost_estimate=cost,
    )(weight, img3, noise3)

    return out3.reshape(B, C, H, W)


# ---------------------------------------------------------------------------
# Demo / correctness checks
# ---------------------------------------------------------------------------
if __name__ == "__main__":
    key = jax.random.PRNGKey(0)
    k_img, k_noise, k_rng = jax.random.split(key, 3)

    B, C, H, W = 2, 4, 16, 16
    image = jax.random.normal(k_img, (B, C, H, W), dtype=jnp.float32)
    noise = jax.random.normal(k_noise, (B, 1, H, W), dtype=jnp.float32)
    # Parameter per __init__ is zeros(1); use a nonzero value so the broadcast
    # noise path is actually exercised numerically.
    weight = jnp.full((1,), 0.5, dtype=jnp.float32)

    # Explicit-noise path vs pure-JAX reference.
    out = jax.block_until_ready(noise_injection(image, weight, noise))
    ref = image + weight[0] * noise
    assert out.shape == (B, C, H, W)
    assert jnp.allclose(out, ref, atol=1e-6, rtol=1e-6), "mismatch vs reference"

    # Larger, production-like shape to exercise channel/HW blocking.
    B2, C2, H2, W2 = 2, 64, 64, 64
    img_big = jax.random.normal(k_img, (B2, C2, H2, W2), dtype=jnp.float32)
    nz_big = jax.random.normal(k_noise, (B2, 1, H2, W2), dtype=jnp.float32)
    out_big = jax.block_until_ready(noise_injection(img_big, weight, nz_big))
    ref_big = img_big + weight[0] * nz_big
    assert jnp.allclose(out_big, ref_big, atol=1e-6, rtol=1e-6), "big mismatch"

    # bf16 image with f32 noise (no wrapper-side noise cast; f32 math in-kernel).
    img_bf16 = img_big.astype(jnp.bfloat16)
    out_bf16 = jax.block_until_ready(noise_injection(img_bf16, weight, nz_big))
    ref_bf16 = (img_bf16.astype(jnp.float32)
                + weight[0] * nz_big).astype(jnp.bfloat16)
    assert out_bf16.dtype == jnp.bfloat16
    assert jnp.allclose(out_bf16.astype(jnp.float32),
                        ref_bf16.astype(jnp.float32), atol=1e-2, rtol=1e-2)

    # noise=None path: noise drawn from `key` in the wrapper, broadcast over C.
    out_rng = jax.block_until_ready(
        noise_injection(image, weight, None, key=k_rng))
    assert out_rng.shape == (B, C, H, W)
    recovered = (out_rng - image) / weight[0]
    assert jnp.all(jnp.isfinite(recovered))
    # Channel-broadcast: recovered noise identical across the channel axis.
    assert jnp.allclose(recovered, recovered[:, :1], atol=1e-5)
    # Loose N(0,1) sanity check on the per-batch noise slab.
    nz = recovered[:, 0]
    assert abs(float(jnp.mean(nz))) < 0.5
    assert 0.5 < float(jnp.std(nz)) < 1.5
    # Determinism: same key -> same output (tiling-independent reproducibility).
    out_rng2 = jax.block_until_ready(
        noise_injection(image, weight, None, key=k_rng))
    assert jnp.allclose(out_rng, out_rng2)

    print("KERNEL_OK")
</pallas_src>

<mosaic_0001>
module attributes {stable_mosaic.version = 11 : i64} {
  func.func @_noise_add_kernel(%arg0: i32, %arg1: i32, %arg2: i32, %arg3: memref<1xf32, #tpu.memory_space<smem>>, %arg4: memref<1x4x256xf32, #tpu.memory_space<vmem>>, %arg5: memref<1x1x256xf32, #tpu.memory_space<vmem>>, %arg6: memref<1x4x256xf32, #tpu.memory_space<vmem>>) attributes {dimension_semantics = [#tpu.dimension_semantics<parallel>, #tpu.dimension_semantics<parallel>, #tpu.dimension_semantics<arbitrary>], iteration_bounds = array<i64: 2, 1, 1>, scalar_prefetch = 0 : i64, scratch_operands = 0 : i64, tpu.core_type = #tpu.core_type<tc>, window_params = [{transform_indices = @transform_0, window_bounds = array<i64: 1>}, {transform_indices = @transform_1, window_bounds = array<i64: 1, 4, 256>}, {transform_indices = @transform_2, window_bounds = array<i64: 1, 1, 256>}, {transform_indices = @transform_3, window_bounds = array<i64: 1, 4, 256>}]} {
    %c0 = arith.constant 0 : index
    %c0_0 = arith.constant 0 : index
    %c0_1 = arith.constant 0 : index
    %0 = vector.load %arg4[%c0, %c0_0, %c0_1] : memref<1x4x256xf32, #tpu.memory_space<vmem>>, vector<1x4x256xf32>
    %c0_2 = arith.constant 0 : index
    %c0_3 = arith.constant 0 : index
    %c0_4 = arith.constant 0 : index
    %1 = vector.load %arg5[%c0_2, %c0_3, %c0_4] : memref<1x1x256xf32, #tpu.memory_space<vmem>>, vector<1x1x256xf32>
    %c0_5 = arith.constant 0 : index
    %2 = memref.load %arg3[%c0_5] : memref<1xf32, #tpu.memory_space<smem>>
    %3 = vector.broadcast %2 : f32 to vector<1x1x256xf32>
    %4 = arith.mulf %3, %1 : vector<1x1x256xf32>
    %5 = vector.broadcast %4 : vector<1x1x256xf32> to vector<1x4x256xf32>
    %6 = arith.addf %0, %5 : vector<1x4x256xf32>
    %c0_6 = arith.constant 0 : index
    %c0_7 = arith.constant 0 : index
    %c0_8 = arith.constant 0 : index
    %7 = vector.load %arg6[%c0_6, %c0_7, %c0_8] : memref<1x4x256xf32, #tpu.memory_space<vmem>>, vector<1x4x256xf32>
    tpu.vector_store %arg6[%c0_6, %c0_7, %c0_8], %6 {strides = array<i32>} : memref<1x4x256xf32, #tpu.memory_space<vmem>>, vector<1x4x256xf32>,
    return
  }
  func.func @transform_0(%arg0: i32, %arg1: i32, %arg2: i32) -> i32 {
    %c0_i32 = arith.constant 0 : i32
    %c0_i32_0 = arith.constant 0 : i32
    return %c0_i32 : i32
  }
  func.func @transform_1(%arg0: i32, %arg1: i32, %arg2: i32) -> (i32, i32, i32) {
    %c0_i32 = arith.constant 0 : i32
    return %arg0, %arg2, %arg1 : i32, i32, i32
  }
  func.func @transform_2(%arg0: i32, %arg1: i32, %arg2: i32) -> (i32, i32, i32) {
    %c0_i32 = arith.constant 0 : i32
    %c0_i32_0 = arith.constant 0 : i32
    return %arg0, %c0_i32, %arg1 : i32, i32, i32
  }
  func.func @transform_3(%arg0: i32, %arg1: i32, %arg2: i32) -> (i32, i32, i32) {
    %c0_i32 = arith.constant 0 : i32
    return %arg0, %arg2, %arg1 : i32, i32, i32
  }
}

</mosaic_0001>

<bundles_post_ra>
// kernel: tpu_custom_call.1
= control target key start
LH: loop header
LB: loop body
LE: loop exit
PB: predicated region body
PF: predicated region fallthrough
CT: control target
= control target key end

     0   :  { %s793_s0 = inlined_call_operand.<no memory space> [shape: f32[1], index: 0, kind: input, shape index: {}]   ;;  %s794_s1 = inlined_call_operand.hbm [shape: f32[2,4,256], index: 1, kind: input, shape index: {}]   ;;  %s795_s2 = inlined_call_operand.vmem [shape: f32[2,1,256], index: 2, kind: input, shape index: {}]   ;;  %s796_s3 = inlined_call_operand.hbm [shape: f32[2,4,256], index: 3, kind: output, shape index: {}]  }
   0x1   :  { %8 = sst [smem:[#allocation2]] %s793_s0 }
   0x2   :  { %9 = vsyncpa [#allocation4], 0 }
   0x3   :  { %11 = vsyncpa [#allocation4 + $0x1], 0 }
   0x4   :  { %12 = vsyncpa [#allocation5], 0 }
   0x5   :  { %14 = vsyncpa [#allocation5 + $0x1], 0  ;;  %s616_s14 = smov 0   ;;  %s618_s15 = smov 0  }
   0x6   :  { %s620_s16 = smov 0   ;;  %s622_s17 = smov 0  }
   0x7   :  { %s624_s18 = smov 0   ;;  %s626_s19 = smov 0  }
   0x8 LB: > { %s397_s0 = sadd.s32 4294967295, %s589_s19   ;;  %s398_s20 = sadd.s32 4294967294, %s589_s19   ;;  %s589_s19 = sphi %s626_s19, %s20_s19   ;;  %s585_s18 = sphi %s624_s18, %s812_s18   ;;  %s581_s17 = sphi %s622_s17, %s811_s17   ;;  %s577_s16 = sphi %s620_s16, %s810_s16   ;;  %s573_s15 = sphi %s618_s15, %s809_s15   ;;  %s569_s14 = sphi %s616_s14, %s808_s14  }
   0x9   : > { %s39_s21 = sadd.s32 1, %s585_s18  ;;  %s71_s22 = sadd.s32 1, %s577_s16 }
   0xa   : > { %p41_p0 = scmp.ge.s32.totalorder %s39_s21, 2  ;;  %p78_p1 = scmp.ne.s32.totalorder %s577_s16, %s573_s15 }
   0xb   : > { %p79_p2 = scmp.eq.s32.totalorder %s589_s19, 0  ;;  %p84_p3 = scmp.ne.s32.totalorder %s573_s15, %s569_s14 }
   0xc   : > { %s814_s21 = smov (%p41_p0, %s39_s21), 0  ;;  %p85_p5 = scmp.eq.s32.totalorder %s397_s0, 0 }
   0xd   : > { %p657_p4 = por %p79_p2, %p78_p1  ;;  %s64_s24 = ssub.s32 %s585_s18, %s814_s21 }
   0xe   : > { %p140_p6 = scmp.eq.s32.totalorder %s397_s0, 1  ;;  %p69_p7 = scmp.eq.s32.totalorder %s64_s24, 0 }
   0xf   : > { %p663_p8 = por %p85_p5, %p84_p3  ;;  %p146_p10 = scmp.eq.s32.totalorder %s398_s20, 1 }
  0x10   : > { %p667_p9 = por %p140_p6, %p78_p1  ;;  %p427_p13 = scmp.lt.s32.totalorder %s589_s19, 2 }
  0x11   : > { %s672_s27 = scalar_select %p69_p7, %s577_s16, %s71_s22  }
  0x12   : > { %s800_s26 = scalar_select %p667_p9, 1, 0 }
  0x13   : > { %p674_p11 = por %p146_p10, %p84_p3  ;;  %s169_s29 = sand.u32 1, %s577_s16  }
  0x14   : > { %s401_s30 = sshll.u32 %s169_s29, 3  ;;  %s413_s4 = sshll.u32 %s585_s18, 7 }
  0x15   : > { %s801_s28 = scalar_select %p674_p11, 1, 0 }
  0x16   : > { %s685_s7 = scalar_lea.hbm %s794_s1, %s413_s4  ;;  %s173_s8 = scalar_lea.vmem [#allocation3], %s401_s30 }
  0x17   : > { %s185_s9 = sshll.u32 %s173_s8, 4  ;;  %p691_p0 = pnand %p427_p13, %p657_p4  ;;  %s687_s9 = int_to_ptr.vmem [resolvable:$true] %s185_s9 }
  0x18   : > { %s170_s11 = scalar_lea.sflag [#allocation4], %s169_s29  ;;  %s477_s12 = scalar_lea.hbm %s685_s7, 128 }
  0x19   : > { %p478_p3 = scmp.ne.s32.totalorder %s685_s7, %s477_s12  ;;  %p479_p5 = pneg %p691_p0 }
  0x1a   : > { %s482_s20 = scalar_lea.hbm %s794_s1, 256  ;;  %p483_p4 = scmp.lt.u32.totalorder %s685_s7, %s794_s1 }
  0x1b   : > { %p480_p6 = pnand %p479_p5, %p478_p3  ;;  %p484_p10 = scmp.lt.u32.totalorder %s482_s20, %s477_s12 }
  0x1c   : > { %p486_p12 = scmp.lt.u32.totalorder %s477_s12, %s685_s7 }
  0x1d   : > { %p481_p7 = pneg %p480_p6  ;;  %p485_p13 = por %p484_p10, %p483_p4 }
  0x1f   : > { %p487_p1 = por %p486_p12, %p485_p13 }
  0x21   : > { %p488_p2 = pnand %p487_p1, %p481_p7 }
  0x23   : > { %491 = shalt.err (!%p488_p2)
}
  0x24   : > { %s492_s24 = scalar_lea.vmem %s687_s9, 128  ;;  %s591_s29 = smov [#allocation3]  }
  0x25   : > { %p493_p3 = scmp.ne.s32.totalorder %s687_s9, %s492_s24  ;;  %s497_s30 = sshll.u32 %s591_s29, 4  ;;  %s498_s30 = int_to_ptr.vmem [resolvable:$false] %s497_s30 }
  0x26   : > { %s499_s4 = scalar_lea.vmem %s498_s30, 256  ;;  %p500_p9 = scmp.lt.s32.totalorder %s687_s9, %s498_s30 }
  0x27   : > { %p495_p6 = pnand %p493_p3, %p479_p5  ;;  %p501_p4 = scmp.lt.s32.totalorder %s499_s4, %s492_s24 }
  0x29   : > { %p496_p11 = pneg %p495_p6  ;;  %p502_p10 = por %p501_p4, %p500_p9 }
  0x2b   : > { %p503_p12 = pnand %p502_p10, %p496_p11 }
  0x2d   : > { %506 = shalt.err (!%p503_p12)
}
  0x2e   : > { %422 = dma.hbm_to_vmem [thread:$0]  (!%p691_p0), %s685_s7, 128, %s687_s9, %s170_s11  }
  0x2f   : > { %p803_p1 = scmp.lt.s32.totalorder %s589_s19, 3  ;;  %p804_p2 = scmp.ge.s32.totalorder %s589_s19, 1 }
  0x31   : > { %p203_p5 = pnand %p804_p2, %p803_p1 }
  0x32   : > { %s727_s5 = sand.u32 (!%p203_p5), 1, %s573_s15  }
  0x33   : > { %206 = sbr.rel (%p203_p5) target bundleno = 88 (0x58), region = 32  ;;  %s405_s6 = sshll.u32 (!%p203_p5), %s727_s5, 3 }
  0x34   : > { %s209_s8 = scalar_lea.sflag (!%p203_p5), [#allocation4], %s727_s5  ;;  %s212_s12 = scalar_lea.vmem (!%p203_p5), [#allocation3], %s405_s6 }
  0x3a   : > { %560 = dma.done.wait (%p663_p8), %s209_s8, 128  }
  0x3b   : > { %562 = vsyncadd (%p663_p8), %s209_s8, 4294967168  ;;  %p245_p9 = scmp.lt.s32.totalorder %s581_s17, 1  ;;  %v260_v0 = vlaneseq  ;;  %s256_s7 = sld [smem:[#allocation2]]  ;;  %v254_v9 = vld [vmem:[%s212_s12] sm:$0xff] }
  0x3c   : > { %s242_s25 = scalar_lea.vmem [#allocation6], %s405_s6  ;;  %s414_s22 = sshll.u32 %s581_s17, 7 }
  0x3d   : > { %s246_s9 = scalar_select %p245_p9, %s581_s17, 1  ;;  %v261_v1 = vshrl.u32 %v260_v0, 7 }
  0x3e   : > { %s291_s20 = sshll.u32 %s242_s25, 4  ;;  %s746_s29 = scalar_lea.hbm %s796_s3, %s414_s22  ;;  %s741_s20 = int_to_ptr.vmem [resolvable:$true] %s291_s20 }
  0x3f   : > { %s407_s10 = sshll.u32 %s246_s9, 1  ;;  %v262_v2 = vsub.s32 0, %v261_v1  ;;  %v266_v3 = vsub.s32 1, %v261_v1  ;;  %s273_s30 = scalar_lea.sflag [#allocation5], %s727_s5 }
  0x40   : > { %s251_s0 = scalar_lea.vmem %s795_s2, %s407_s10  ;;  %s507_s4 = scalar_lea.vmem %s741_s20, 128 }
  0x41   : > { %v255_v4 = vld [vmem:[%s251_s0] sm:$0x3]  ;;  %v257_v5 = vstv %s256_s7  ;;  %p508_p8 = scmp.ne.s32.totalorder %s741_s20, %s507_s4  ;;  %p805_p11 = scmp.ne.s32.totalorder %s800_s26, 0 }
  0x42   : > { %v258_v6 = vmul.f32 %v257_v5, %v255_v4  ;;  %s592_s17 = smov [#allocation6]  }
  0x43   : > { %p509_p0 = pnand %p508_p8, %p805_p11  ;;  %s511_s6 = sshll.u32 %s592_s17, 4  ;;  %s512_s6 = int_to_ptr.vmem [resolvable:$false] %s511_s6 }
  0x44   : > { %v263_v7 = vrot.slane %v258_v6, %v262_v2  ;;  %v267_v8 = vrot.slane %v258_v6, %v266_v3  ;;  %s513_s8 = scalar_lea.vmem %s512_s6, 256  ;;  %p514_p13 = scmp.lt.s32.totalorder %s741_s20, %s512_s6 }
  0x45   : > { %p510_p7 = pneg %p509_p0  ;;  %p515_p3 = scmp.lt.s32.totalorder %s513_s8, %s507_s4 }
  0x46   : > { %v268_v10 = vcombine.low %v263_v7, %v267_v8 }
  0x47   : > { %p516_p6 = por %p515_p3, %p514_p13 }
  0x48   : > { %v270_v11 = vadd.f32 %v268_v10, %v254_v9 }
  0x49   : > { %p517_p4 = pnand %p516_p6, %p510_p7 }
  0x4a   : > { %271 = vst [vmem:[%s242_s25] sm:$0xff] %v270_v11 }
  0x4b   : > { %520 = shalt.err (!%p517_p4)
}
  0x4c   : > { %s521_s5 = scalar_lea.hbm %s746_s29, 128  ;;  %s525_s9 = scalar_lea.hbm %s796_s3, 256 }
  0x4d   : > { %p522_p10 = scmp.ne.s32.totalorder %s746_s29, %s521_s5  ;;  %p526_p2 = scmp.lt.u32.totalorder %s746_s29, %s796_s3 }
  0x4e   : > { %p527_p5 = scmp.lt.u32.totalorder %s525_s9, %s521_s5  ;;  %p529_p8 = scmp.lt.u32.totalorder %s521_s5, %s746_s29 }
  0x4f   : > { %p523_p12 = pnand %p522_p10, %p805_p11 }
  0x50   : > { %p528_p9 = por %p527_p5, %p526_p2 }
  0x51   : > { %p524_p1 = pneg %p523_p12 }
  0x52   : > { %p530_p0 = por %p529_p8, %p528_p9 }
  0x54   : > { %p531_p7 = pnand %p530_p0, %p524_p1 }
  0x56   : > { %534 = shalt.err (!%p531_p7)
}
  0x57   : > { %417 = dma.vmem_to_hbm [thread:$0]  (%p805_p11), %s741_s20, 128, %s746_s29, %s273_s30  }
  0x58 PF: > { %s303_s13 = sand.u32 1, %s569_s14   ;;  %p806_p13 = scmp.ne.s32.totalorder %s801_s28, 0 }
  0x59   : > { %p807_p3 = scmp.ge.s32.totalorder %s589_s19, 2  ;;  %s304_s0 = scalar_lea.sflag [#allocation5], %s303_s13 }
  0x5b   : > { %p424_p6 = pnand %p807_p3, %p806_p13 }
  0x5d   : > { %564 = dma.done.wait (!%p424_p6), %s304_s0, 128  }
  0x5e   : > { %566 = vsyncadd (!%p424_p6), %s304_s0, 4294967168  ;;  %s20_s19 = sadd.s32 1, %s589_s19   ;;  %s808_s14 = smov %s573_s15 }
  0x5f   : > { %p17_p4 = scmp.ge.s32.totalorder %s20_s19, 4   ;;  %s809_s15 = smov %s577_s16 }
  0x60   : > { %s810_s16 = smov %s672_s27  ;;  %s811_s17 = smov %s585_s18 }
  0x61   : > { %s812_s18 = smov %s814_s21  ;;  %19 = sbr.rel (!%p17_p4) target bundleno = 8 (0x8), region = 80 }
  0x68   :  { %309 = vsyncpa [#allocation4], 1 }
  0x69   :  { %311 = vsyncpa [#allocation4 + $0x1], 1 }
  0x6a   :  { %312 = vsyncpa [#allocation5], 1 }
  0x6b   :  { %314 = vsyncpa [#allocation5 + $0x1], 1 }

</bundles_post_ra>
